<compile_context>
chip_gen: v6e
topology: v6e:2x2x1
jax: 0.10.0
libtpu: 0.0.40
codegen_flags: <defaults>
</compile_context>

<pallas_src>
import functools
import math

import jax
import jax.numpy as jnp
from jax.experimental import pallas as pl
from jax.experimental.pallas import tpu as pltpu


def _make_pe(d_model: int, max_len: int = 5000) -> jnp.ndarray:
    """Sinusoidal positional-encoding buffer, shape (max_len, 1, d_model).

    Mirrors the PyTorch module's buffer construction (fp32, sin on even
    columns, cos on odd columns)."""
    position = jnp.arange(max_len, dtype=jnp.float32)[:, None]              # (max_len, 1)
    div_term = jnp.exp(
        jnp.arange(0, d_model, 2, dtype=jnp.float32) * (-math.log(10000.0) / d_model)
    )                                                                        # (ceil(d/2),)
    angles = position * div_term                                             # (max_len, ceil(d/2))
    pe = jnp.zeros((max_len, d_model), dtype=jnp.float32)
    pe = pe.at[:, 0::2].set(jnp.sin(angles))
    pe = pe.at[:, 1::2].set(jnp.cos(angles)[:, : d_model // 2])              # odd-d safe
    return pe[:, None, :]                                                    # (max_len, 1, d_model)


def _pos_enc_kernel(x_ref, pe_ref, o_ref, *, n_rep: int):
    # x_ref/o_ref: (TS, TB*D) lane-dense view; pe_ref: (TS, D).
    pe = pe_ref[...]
    if n_rep > 1:
        # Broadcast pe over the batch tile once per grid step (VMEM-only lane
        # concat), then ONE wide add + store -- no per-batch masked stores.
        pe = jnp.concatenate([pe] * n_rep, axis=1)
    o_ref[...] = x_ref[...] + pe


def _vmem_policy() -> tuple[int, int]:
    """(target x-block bytes, vmem_limit cap) tuned per TPU generation."""
    try:
        vmem = int(pltpu.get_tpu_info().vmem_capacity_bytes)
    except Exception:  # pragma: no cover - non-TPU / API unavailable
        vmem = 64 * 1024 * 1024
    if vmem >= 96 * 1024 * 1024:
        # v5e / v6e: 128 MiB VMEM, single TensorCore -> few, large tiles.
        return 8 * 1024 * 1024, 64 * 1024 * 1024
    # v7x: 64 MiB per TC, 2 TCs -> modest tiles, tighter VMEM cap.
    return 4 * 1024 * 1024, 32 * 1024 * 1024


def _choose_batch_tile(B: int, D: int, dsize: int, target_bytes: int) -> int:
    """Batches per block.  Keep the full batch unless 8 rows x B*D would blow
    the block budget; partial-batch tiles must keep TB*D a multiple of 128
    (BlockSpec last-dim constraint + unmasked stores)."""
    if B * D * dsize * 8 <= target_bytes:
        return B
    for cand in range(B - 1, 0, -1):
        if B % cand == 0 and (cand * D) % 128 == 0 and cand * D * dsize * 8 <= target_bytes:
            return cand
    return B  # no valid split: accept oversized rows (vmem_limit raised below)


def _choose_seq_tile(S: int, max_rows: int, force_multi_step: bool) -> int:
    """Rows per block: multiple of 8 (or == S), <= max_rows, preferring a
    divisor of S so every tile is full; split into >=2 steps only when the
    whole problem would otherwise be a single block (feeds both v7x TCs)."""
    if S <= 8:
        return S
    upper = min(S, max(8, max_rows))
    if force_multi_step and upper >= S and S >= 16:
        upper = max(8, (S // 2) // 8 * 8)
    if upper >= S:
        return S
    upper = max(8, upper // 8 * 8)
    for d in range(upper, 7, -8):          # largest multiple of 8 dividing S
        if S % d == 0:
            return d
    return upper                            # single partial trailing tile


@jax.jit
def positional_encoding(x: jnp.ndarray, pe: jnp.ndarray) -> jnp.ndarray:
    """Forward of PositionalEncoding: x + pe[:S], broadcast over batch.

    x:  (S, B, D) seq-first, as in the PyTorch module.
    pe: (max_len, 1, D) fp32 buffer (output of _make_pe)."""
    S, B, D = x.shape
    dsize = jnp.dtype(x.dtype).itemsize

    # Slice/cast of the tiny (S, D) pe fuses into this jitted graph.
    pe2 = pe[:S, 0, :]
    if pe2.dtype != x.dtype:
        pe2 = pe2.astype(x.dtype)

    # Lane-dense 2D view: element (s, b, d) -> row s, column b*D + d.
    x2 = x.reshape(S, B * D)

    target_bytes, vmem_cap = _vmem_policy()

    TB = _choose_batch_tile(B, D, dsize, target_bytes)
    row_bytes = TB * D * dsize
    max_rows = max(8, (target_bytes // max(1, row_bytes)) // 8 * 8)
    TS = _choose_seq_tile(S, max_rows, force_multi_step=(TB == B))

    grid = (pl.cdiv(S, TS), B // TB)

    # Pallas double-buffers each BlockSpec: footprint ~= 2 * (x + out + pe).
    blk = TS * TB * D * dsize
    pe_blk = TS * D * dsize
    footprint = 2 * (2 * blk + pe_blk)
    vmem_limit = max(16 * 1024 * 1024, min(vmem_cap, footprint + footprint // 4))
    if footprint > vmem_limit:             # forced oversized block: give it room
        vmem_limit = footprint + footprint // 8

    cost = pl.CostEstimate(
        flops=S * B * D,
        transcendentals=0,
        bytes_accessed=2 * S * B * D * dsize + S * D * jnp.dtype(pe2.dtype).itemsize,
    )

    out2 = pl.pallas_call(
        functools.partial(_pos_enc_kernel, n_rep=TB),
        out_shape=jax.ShapeDtypeStruct((S, B * D), x.dtype),
        grid_spec=pltpu.PrefetchScalarGridSpec(
            num_scalar_prefetch=0,
            grid=grid,
            in_specs=[
                pl.BlockSpec((TS, TB * D), lambda i, j: (i, j)),   # x, lane-dense
                pl.BlockSpec((TS, D), lambda i, j: (i, 0)),        # pe, reused across batch
            ],
            out_specs=pl.BlockSpec((TS, TB * D), lambda i, j: (i, j)),
        ),
        compiler_params=pltpu.CompilerParams(
            dimension_semantics=("parallel", "parallel"),
            vmem_limit_bytes=int(vmem_limit),
        ),
        cost_estimate=cost,
    )(x2, pe2)

    return out2.reshape(S, B, D)


if __name__ == "__main__":
    key = jax.random.PRNGKey(0)

    # Test 1: module-consistent small shapes (seq=8, batch=2, d_model=32).
    S, B, D = 8, 2, 32
    pe = _make_pe(D, max_len=64)
    x = jax.random.normal(key, (S, B, D), dtype=jnp.float32)
    out = jax.block_until_ready(positional_encoding(x, pe))
    ref = x + pe[:S]
    assert out.shape == (S, B, D)
    assert jnp.allclose(out, ref, atol=1e-6, rtol=1e-6), "mismatch vs reference (test 1)"

    # Test 2: S not divisible by the seq tile (partial trailing block) and a
    # 128-aligned lane dim (exercises the unmasked-store fast path).
    S2, B2, D2 = 20, 2, 128
    pe_b = _make_pe(D2, max_len=64)
    x_b = jax.random.normal(jax.random.PRNGKey(0), (S2, B2, D2), dtype=jnp.float32)
    out_b = jax.block_until_ready(positional_encoding(x_b, pe_b))
    ref_b = x_b + pe_b[:S2]
    assert jnp.allclose(out_b, ref_b, atol=1e-6, rtol=1e-6), "mismatch vs reference (test 2)"

    print("KERNEL_OK")
</pallas_src>

<mosaic_0001>
module attributes {stable_mosaic.version = 11 : i64} {
  func.func @_pos_enc_kernel(%arg0: i32, %arg1: i32, %arg2: memref<8x64xf32, #tpu.memory_space<vmem>>, %arg3: memref<8x32xf32, #tpu.memory_space<vmem>>, %arg4: memref<8x64xf32, #tpu.memory_space<vmem>>) attributes {dimension_semantics = [#tpu.dimension_semantics<parallel>, #tpu.dimension_semantics<parallel>], iteration_bounds = array<i64: 1, 1>, scalar_prefetch = 0 : i64, scratch_operands = 0 : i64, tpu.core_type = #tpu.core_type<tc>, window_params = [{transform_indices = @transform_0, window_bounds = array<i64: 8, 64>}, {transform_indices = @transform_1, window_bounds = array<i64: 8, 32>}, {transform_indices = @transform_2, window_bounds = array<i64: 8, 64>}]} {
    %c0 = arith.constant 0 : index
    %c0_0 = arith.constant 0 : index
    %0 = vector.load %arg3[%c0, %c0_0] : memref<8x32xf32, #tpu.memory_space<vmem>>, vector<8x32xf32>
    %1 = tpu.concatenate %0, %0 in 1 : vector<8x32xf32>, vector<8x32xf32> -> vector<8x64xf32>
    %c0_1 = arith.constant 0 : index
    %c0_2 = arith.constant 0 : index
    %2 = vector.load %arg2[%c0_1, %c0_2] : memref<8x64xf32, #tpu.memory_space<vmem>>, vector<8x64xf32>
    %3 = arith.addf %2, %1 : vector<8x64xf32>
    %c0_3 = arith.constant 0 : index
    %c0_4 = arith.constant 0 : index
    %4 = vector.load %arg4[%c0_3, %c0_4] : memref<8x64xf32, #tpu.memory_space<vmem>>, vector<8x64xf32>
    tpu.vector_store %arg4[%c0_3, %c0_4], %3 {strides = array<i32>} : memref<8x64xf32, #tpu.memory_space<vmem>>, vector<8x64xf32>,
    return
  }
  func.func @transform_0(%arg0: i32, %arg1: i32) -> (i32, i32) {
    %c0_i32 = arith.constant 0 : i32
    return %arg0, %arg1 : i32, i32
  }
  func.func @transform_1(%arg0: i32, %arg1: i32) -> (i32, i32) {
    %c0_i32 = arith.constant 0 : i32
    %c0_i32_0 = arith.constant 0 : i32
    return %arg0, %c0_i32 : i32, i32
  }
  func.func @transform_2(%arg0: i32, %arg1: i32) -> (i32, i32) {
    %c0_i32 = arith.constant 0 : i32
    return %arg0, %arg1 : i32, i32
  }
}

</mosaic_0001>

<bundles_post_ra>
// kernel: positional_encoding.1
= control target key start
LH: loop header
LB: loop body
LE: loop exit
PB: predicated region body
PF: predicated region fallthrough
CT: control target
= control target key end

     0   :  { %s27_s11 = smov 32   ;;  %vm16_vm0 = vcmask 261120   ;;  %vm20_vm1 = vcmask 523264   ;;  %s52_s1 = inlined_call_operand.vmem [shape: f32[8,32], index: 1, kind: input, shape index: {}]   ;;  %s53_s0 = inlined_call_operand.vmem [shape: f32[8,64], index: 0, kind: input, shape index: {}]   ;;  %s54_s2 = inlined_call_operand.vmem [shape: f32[8,64], index: 2, kind: output, shape index: {}]  }
   0x1   :  { %v11_v0 = vld [vmem:[%s52_s1] sm:$0xff] }
   0x2   :  { %13 = vrot.lane.b32.xlu0 %v11_v0, %s27_s11  ;;  %v18_v1 = vld [vmem:[%s53_s0] sm:$0xff] }
  0x74   :  { %v14_v2 = vpop.permute.xlu0 %13 }
  0x75   :  { %v17_v3 = vsel %vm16_vm0, %v11_v0, %v14_v2 }
  0x76   :  { %v19_v4 = vadd.f32 %v18_v1, %v17_v3 }
  0x78   :  { %21 = vst.msk [vmem:[%s54_s2] sm:$0xff] %vm20_vm1, %v19_v4 }

</bundles_post_ra>
